<compile_context>
chip_gen: v7x
topology: tpu7x:2x2x1
jax: 0.10.0
libtpu: 0.0.40
codegen_flags: <defaults>
</compile_context>

<pallas_src>
import functools

import jax
import jax.numpy as jnp
from jax.experimental import pallas as pl
from jax.experimental.pallas import tpu as pltpu

IN_FEAT = 784
H1, H2 = 256, 128
H3 = 64
H3_PAD = 128          # fc3 output zero-padded 64 -> 128 (lane-dense, exact)
N_CLASSES = 10


def _mlp_kernel(x_ref, w1_ref, b1_ref, w2_ref, b2_ref,
                w3_ref, b3_ref, w4_ref, b4_ref, o_ref):
    # fc1..fc3: bf16 inputs on the MXU, f32 accumulation. Elementwise
    # (bias, ReLU, softmax) stays in f32.
    x = x_ref[...].astype(jnp.bfloat16)          # f32 HBM stream, bf16 MXU
    h = jnp.dot(x, w1_ref[...], preferred_element_type=jnp.float32)
    h = jnp.maximum(h + b1_ref[...], 0.0)
    h = jnp.dot(h.astype(jnp.bfloat16), w2_ref[...],
                preferred_element_type=jnp.float32)
    h = jnp.maximum(h + b2_ref[...], 0.0)
    h = jnp.dot(h.astype(jnp.bfloat16), w3_ref[...],
                preferred_element_type=jnp.float32)
    h = jnp.maximum(h + b3_ref[...], 0.0)        # padded lanes stay exactly 0
    # fc4 is tiny (128x10): keep it in f32 for tighter log-prob accuracy.
    logits = jnp.dot(h, w4_ref[...], preferred_element_type=jnp.float32)
    logits = logits + b4_ref[...]
    # Numerically stable log_softmax over the 10-class axis.
    m = jnp.max(logits, axis=-1, keepdims=True)
    shifted = logits - m
    lse = jnp.log(jnp.sum(jnp.exp(shifted), axis=-1, keepdims=True))
    o_ref[...] = (shifted - lse).astype(o_ref.dtype)


def prepare_params(params):
    """Pad + cast PyTorch-layout params for the kernel (do this once).

    Input: (w1, b1, ..., w4, b4) with w_i (in, out) f32 and b_i (1, out) f32.
    Output: fc1..fc3 weights cast to bf16; fc3 output (and fc4 input) padded
    64 -> 128 with zeros (numerically exact); fc4 kept in f32; biases f32.
    """
    w1, b1, w2, b2, w3, b3, w4, b4 = params
    f32 = lambda a: a.astype(jnp.float32)
    bf16 = lambda a: a.astype(jnp.bfloat16)
    w3p = jnp.pad(f32(w3), ((0, 0), (0, H3_PAD - w3.shape[1])))
    b3p = jnp.pad(f32(b3), ((0, 0), (0, H3_PAD - b3.shape[1])))
    w4p = jnp.pad(f32(w4), ((0, H3_PAD - w4.shape[0]), (0, 0)))
    return (bf16(w1), f32(b1),
            bf16(w2), f32(b2),
            bf16(w3p), f32(b3p),
            w4p, f32(b4))        # fc4 stays f32


def _batch_tile(B, tile_b):
    """Batch tile: multiple of 16 (bf16 sublane packing), never larger than B,
    and small enough to leave >= 2 grid steps when B allows so the 'parallel'
    batch axis can shard across both v7x TensorCores (no-op on v5e/v6e)."""
    if B < 8:
        return B                     # full-dim block (legal for any size)
    if B < 16:
        return 8
    tb = min(tile_b, (B // 16) * 16)
    if B >= 32:
        tb = min(tb, max(16, ((B // 2) // 16) * 16))
    return tb


def classifier_forward(x_nchw, prepared_params, *, tile_b=512):
    """x_nchw: (B, 1, 28, 28) float. Returns (B, 10) f32 log-probabilities."""
    w1, b1, w2, b2, w3, b3, w4, b4 = prepared_params
    B = x_nchw.shape[0]
    # == x.view(B, -1) on contiguous NCHW; free view, no pad/cast HBM pass.
    x = x_nchw.reshape(B, IN_FEAT).astype(jnp.float32)

    tb = _batch_tile(B, tile_b)
    grid = (pl.cdiv(B, tb),)         # uneven B handled via a partial last block

    def full2d(arr):
        # One full block with a constant index_map: weight/bias block index
        # never changes, so it is fetched once and reused across grid steps.
        return pl.BlockSpec(arr.shape, lambda i: (0, 0))

    params_list = (w1, b1, w2, b2, w3, b3, w4, b4)
    flops = 2 * B * (IN_FEAT * H1 + H1 * H2 + H2 * H3_PAD + H3_PAD * N_CLASSES)
    bytes_accessed = (B * IN_FEAT * 4 + B * N_CLASSES * 4
                      + sum(int(a.size) * a.dtype.itemsize for a in params_list))

    out = pl.pallas_call(
        _mlp_kernel,
        out_shape=jax.ShapeDtypeStruct((B, N_CLASSES), jnp.float32),
        grid_spec=pltpu.PrefetchScalarGridSpec(
            num_scalar_prefetch=0,
            grid=grid,
            in_specs=[pl.BlockSpec((tb, IN_FEAT), lambda i: (i, 0))]   # x tile
                     + [full2d(a) for a in params_list],
            out_specs=pl.BlockSpec((tb, N_CLASSES), lambda i: (i, 0)),
        ),
        compiler_params=pltpu.CompilerParams(
            dimension_semantics=("parallel",)),
        cost_estimate=pl.CostEstimate(
            flops=flops,
            transcendentals=B * (N_CLASSES + 1),
            bytes_accessed=bytes_accessed),
    )(x, *params_list)
    return out


def init_params(key):
    """Deterministic init; weights stored as (in, out), biases as (1, out)."""
    sizes = [(IN_FEAT, H1), (H1, H2), (H2, H3), (H3, N_CLASSES)]
    params = []
    for idx, (fan_in, fan_out) in enumerate(sizes):
        kw, kb, key = jax.random.split(jax.random.fold_in(key, idx), 3)
        bound = 1.0 / jnp.sqrt(fan_in)
        w = jax.random.uniform(kw, (fan_in, fan_out), jnp.float32, -bound, bound)
        b = jax.random.uniform(kb, (1, fan_out), jnp.float32, -bound, bound)
        params += [w, b]
    return tuple(params)


def _reference_forward(x_nchw, params):
    """Pure-JAX f32 reference (matches the PyTorch module)."""
    w1, b1, w2, b2, w3, b3, w4, b4 = params
    x = x_nchw.reshape(x_nchw.shape[0], -1)
    x = jax.nn.relu(x @ w1 + b1)
    x = jax.nn.relu(x @ w2 + b2)
    x = jax.nn.relu(x @ w3 + b3)
    return jax.nn.log_softmax(x @ w4 + b4, axis=1)


if __name__ == "__main__":
    key = jax.random.PRNGKey(0)
    k_x, k_p = jax.random.split(key)

    B = 8
    x = jax.random.normal(k_x, (B, 1, 28, 28), jnp.float32)  # NCHW like PyTorch
    params = init_params(k_p)
    prepared = prepare_params(params)

    fwd = jax.jit(functools.partial(classifier_forward, tile_b=512))
    out = jax.block_until_ready(fwd(x, prepared))

    ref = _reference_forward(x, params)
    assert out.shape == (B, N_CLASSES)
    # bf16 MXU inputs for fc1..fc3 with f32 accumulation: tolerance loosened
    # vs. the pure-f32 reference.
    err = float(jnp.max(jnp.abs(out - ref)))
    assert jnp.allclose(out, ref, atol=7.5e-2, rtol=5e-2), err
    print("KERNEL_OK")
</pallas_src>

<mosaic_0001>
module attributes {stable_mosaic.version = 11 : i64} {
  func.func @_mlp_kernel(%arg0: i32, %arg1: memref<8x784xf32, #tpu.memory_space<vmem>>, %arg2: memref<784x256xbf16, #tpu.memory_space<vmem>>, %arg3: memref<1x256xf32, #tpu.memory_space<vmem>>, %arg4: memref<256x128xbf16, #tpu.memory_space<vmem>>, %arg5: memref<1x128xf32, #tpu.memory_space<vmem>>, %arg6: memref<128x128xbf16, #tpu.memory_space<vmem>>, %arg7: memref<1x128xf32, #tpu.memory_space<vmem>>, %arg8: memref<128x10xf32, #tpu.memory_space<vmem>>, %arg9: memref<1x10xf32, #tpu.memory_space<vmem>>, %arg10: memref<8x10xf32, #tpu.memory_space<vmem>>) attributes {dimension_semantics = [#tpu.dimension_semantics<parallel>], iteration_bounds = array<i64: 1>, scalar_prefetch = 0 : i64, scratch_operands = 0 : i64, tpu.core_type = #tpu.core_type<tc>, window_params = [{transform_indices = @transform_0, window_bounds = array<i64: 8, 784>}, {pipeline_mode = #tpu.pipeline_mode<synchronous>, transform_indices = @transform_1, window_bounds = array<i64: 784, 256>}, {pipeline_mode = #tpu.pipeline_mode<synchronous>, transform_indices = @transform_2, window_bounds = array<i64: 1, 256>}, {pipeline_mode = #tpu.pipeline_mode<synchronous>, transform_indices = @transform_3, window_bounds = array<i64: 256, 128>}, {pipeline_mode = #tpu.pipeline_mode<synchronous>, transform_indices = @transform_4, window_bounds = array<i64: 1, 128>}, {pipeline_mode = #tpu.pipeline_mode<synchronous>, transform_indices = @transform_5, window_bounds = array<i64: 128, 128>}, {pipeline_mode = #tpu.pipeline_mode<synchronous>, transform_indices = @transform_6, window_bounds = array<i64: 1, 128>}, {pipeline_mode = #tpu.pipeline_mode<synchronous>, transform_indices = @transform_7, window_bounds = array<i64: 128, 10>}, {pipeline_mode = #tpu.pipeline_mode<synchronous>, transform_indices = @transform_8, window_bounds = array<i64: 1, 10>}, {transform_indices = @transform_9, window_bounds = array<i64: 8, 10>}]} {
    %c0 = arith.constant 0 : index
    %c0_0 = arith.constant 0 : index
    %0 = vector.load %arg1[%c0, %c0_0] : memref<8x784xf32, #tpu.memory_space<vmem>>, vector<8x784xf32>
    %1 = arith.truncf %0 : vector<8x784xf32> to vector<8x784xbf16>
    %c0_1 = arith.constant 0 : index
    %c0_2 = arith.constant 0 : index
    %2 = vector.load %arg2[%c0_1, %c0_2] : memref<784x256xbf16, #tpu.memory_space<vmem>>, vector<784x256xbf16>
    %cst = arith.constant dense<0.000000e+00> : vector<8x256xf32>
    %3 = tpu.matmul %1, %2, %cst {dimension_numbers = #tpu.dot_dimension_numbers<[1], [0], [0], [1], [0, 0, 1, 1], [], []>} : vector<8x784xbf16>, vector<784x256xbf16>, vector<8x256xf32> -> vector<8x256xf32>
    %c0_3 = arith.constant 0 : index
    %c0_4 = arith.constant 0 : index
    %4 = vector.load %arg3[%c0_3, %c0_4] : memref<1x256xf32, #tpu.memory_space<vmem>>, vector<1x256xf32>
    %5 = vector.broadcast %4 : vector<1x256xf32> to vector<8x256xf32>
    %6 = arith.addf %3, %5 : vector<8x256xf32>
    %cst_5 = arith.constant 0.000000e+00 : f32
    %7 = vector.broadcast %cst_5 : f32 to vector<8x256xf32>
    %8 = arith.maximumf %6, %7 : vector<8x256xf32>
    %9 = arith.truncf %8 : vector<8x256xf32> to vector<8x256xbf16>
    %c0_6 = arith.constant 0 : index
    %c0_7 = arith.constant 0 : index
    %10 = vector.load %arg4[%c0_6, %c0_7] : memref<256x128xbf16, #tpu.memory_space<vmem>>, vector<256x128xbf16>
    %cst_8 = arith.constant dense<0.000000e+00> : vector<8x128xf32>
    %11 = tpu.matmul %9, %10, %cst_8 {dimension_numbers = #tpu.dot_dimension_numbers<[1], [0], [0], [1], [0, 0, 1, 1], [], []>} : vector<8x256xbf16>, vector<256x128xbf16>, vector<8x128xf32> -> vector<8x128xf32>
    %c0_9 = arith.constant 0 : index
    %c0_10 = arith.constant 0 : index
    %12 = vector.load %arg5[%c0_9, %c0_10] : memref<1x128xf32, #tpu.memory_space<vmem>>, vector<1x128xf32>
    %13 = vector.broadcast %12 : vector<1x128xf32> to vector<8x128xf32>
    %14 = arith.addf %11, %13 : vector<8x128xf32>
    %cst_11 = arith.constant 0.000000e+00 : f32
    %15 = vector.broadcast %cst_11 : f32 to vector<8x128xf32>
    %16 = arith.maximumf %14, %15 : vector<8x128xf32>
    %17 = arith.truncf %16 : vector<8x128xf32> to vector<8x128xbf16>
    %c0_12 = arith.constant 0 : index
    %c0_13 = arith.constant 0 : index
    %18 = vector.load %arg6[%c0_12, %c0_13] : memref<128x128xbf16, #tpu.memory_space<vmem>>, vector<128x128xbf16>
    %cst_14 = arith.constant dense<0.000000e+00> : vector<8x128xf32>
    %19 = tpu.matmul %17, %18, %cst_14 {dimension_numbers = #tpu.dot_dimension_numbers<[1], [0], [0], [1], [0, 0, 1, 1], [], []>} : vector<8x128xbf16>, vector<128x128xbf16>, vector<8x128xf32> -> vector<8x128xf32>
    %c0_15 = arith.constant 0 : index
    %c0_16 = arith.constant 0 : index
    %20 = vector.load %arg7[%c0_15, %c0_16] : memref<1x128xf32, #tpu.memory_space<vmem>>, vector<1x128xf32>
    %21 = vector.broadcast %20 : vector<1x128xf32> to vector<8x128xf32>
    %22 = arith.addf %19, %21 : vector<8x128xf32>
    %cst_17 = arith.constant 0.000000e+00 : f32
    %23 = vector.broadcast %cst_17 : f32 to vector<8x128xf32>
    %24 = arith.maximumf %22, %23 : vector<8x128xf32>
    %c0_18 = arith.constant 0 : index
    %c0_19 = arith.constant 0 : index
    %25 = vector.load %arg8[%c0_18, %c0_19] : memref<128x10xf32, #tpu.memory_space<vmem>>, vector<128x10xf32>
    %cst_20 = arith.constant dense<0.000000e+00> : vector<8x10xf32>
    %26 = tpu.matmul %24, %25, %cst_20 {dimension_numbers = #tpu.dot_dimension_numbers<[1], [0], [0], [1], [0, 0, 1, 1], [], []>} : vector<8x128xf32>, vector<128x10xf32>, vector<8x10xf32> -> vector<8x10xf32>
    %c0_21 = arith.constant 0 : index
    %c0_22 = arith.constant 0 : index
    %27 = vector.load %arg9[%c0_21, %c0_22] : memref<1x10xf32, #tpu.memory_space<vmem>>, vector<1x10xf32>
    %28 = vector.broadcast %27 : vector<1x10xf32> to vector<8x10xf32>
    %29 = arith.addf %26, %28 : vector<8x10xf32>
    %cst_23 = arith.constant dense<0xFF800000> : vector<8xf32>
    %30 = vector.multi_reduction <maximumf>, %29, %cst_23 [1] : vector<8x10xf32> to vector<8xf32>
    %31 = vector.shape_cast %30 : vector<8xf32> to vector<8x1xf32>
    %32 = vector.broadcast %31 : vector<8x1xf32> to vector<8x10xf32>
    %33 = arith.subf %29, %32 : vector<8x10xf32>
    %34 = math.exp %33 : vector<8x10xf32>
    %cst_24 = arith.constant dense<0.000000e+00> : vector<8xf32>
    %35 = vector.multi_reduction <add>, %34, %cst_24 [1] : vector<8x10xf32> to vector<8xf32>
    %36 = vector.shape_cast %35 : vector<8xf32> to vector<8x1xf32>
    %37 = math.log %36 : vector<8x1xf32>
    %38 = vector.broadcast %37 : vector<8x1xf32> to vector<8x10xf32>
    %39 = arith.subf %33, %38 : vector<8x10xf32>
    %c0_25 = arith.constant 0 : index
    %c0_26 = arith.constant 0 : index
    %40 = vector.load %arg10[%c0_25, %c0_26] : memref<8x10xf32, #tpu.memory_space<vmem>>, vector<8x10xf32>
    tpu.vector_store %arg10[%c0_25, %c0_26], %39 {strides = array<i32>} : memref<8x10xf32, #tpu.memory_space<vmem>>, vector<8x10xf32>,
    return
  }
  func.func @transform_0(%arg0: i32) -> (i32, i32) {
    %c0_i32 = arith.constant 0 : i32
    %c0_i32_0 = arith.constant 0 : i32
    return %arg0, %c0_i32 : i32, i32
  }
  func.func @transform_1(%arg0: i32) -> (i32, i32) {
    %c0_i32 = arith.constant 0 : i32
    %c0_i32_0 = arith.constant 0 : i32
    %c0_i32_1 = arith.constant 0 : i32
    return %c0_i32, %c0_i32_0 : i32, i32
  }
  func.func @transform_2(%arg0: i32) -> (i32, i32) {
    %c0_i32 = arith.constant 0 : i32
    %c0_i32_0 = arith.constant 0 : i32
    %c0_i32_1 = arith.constant 0 : i32
    return %c0_i32, %c0_i32_0 : i32, i32
  }
  func.func @transform_3(%arg0: i32) -> (i32, i32) {
    %c0_i32 = arith.constant 0 : i32
    %c0_i32_0 = arith.constant 0 : i32
    %c0_i32_1 = arith.constant 0 : i32
    return %c0_i32, %c0_i32_0 : i32, i32
  }
  func.func @transform_4(%arg0: i32) -> (i32, i32) {
    %c0_i32 = arith.constant 0 : i32
    %c0_i32_0 = arith.constant 0 : i32
    %c0_i32_1 = arith.constant 0 : i32
    return %c0_i32, %c0_i32_0 : i32, i32
  }
  func.func @transform_5(%arg0: i32) -> (i32, i32) {
    %c0_i32 = arith.constant 0 : i32
    %c0_i32_0 = arith.constant 0 : i32
    %c0_i32_1 = arith.constant 0 : i32
    return %c0_i32, %c0_i32_0 : i32, i32
  }
  func.func @transform_6(%arg0: i32) -> (i32, i32) {
    %c0_i32 = arith.constant 0 : i32
    %c0_i32_0 = arith.constant 0 : i32
    %c0_i32_1 = arith.constant 0 : i32
    return %c0_i32, %c0_i32_0 : i32, i32
  }
  func.func @transform_7(%arg0: i32) -> (i32, i32) {
    %c0_i32 = arith.constant 0 : i32
    %c0_i32_0 = arith.constant 0 : i32
    %c0_i32_1 = arith.constant 0 : i32
    return %c0_i32, %c0_i32_0 : i32, i32
  }
  func.func @transform_8(%arg0: i32) -> (i32, i32) {
    %c0_i32 = arith.constant 0 : i32
    %c0_i32_0 = arith.constant 0 : i32
    %c0_i32_1 = arith.constant 0 : i32
    return %c0_i32, %c0_i32_0 : i32, i32
  }
  func.func @transform_9(%arg0: i32) -> (i32, i32) {
    %c0_i32 = arith.constant 0 : i32
    %c0_i32_0 = arith.constant 0 : i32
    return %arg0, %c0_i32 : i32, i32
  }
}

</mosaic_0001>

<bundles_post_ra>
// kernel: classifier_forward.1
= control target key start
LH: loop header
LB: loop body
LE: loop exit
PB: predicated region body
PF: predicated region fallthrough
CT: control target
= control target key end

     0   :  { %14 = vsyncpa [#allocation3], 0  ;;  %s2261_s0 = inlined_call_operand.vmem [shape: f32[8,784], index: 0, kind: input, shape index: {}]   ;;  %s2262_s1 = inlined_call_operand.vmem [shape: bf16[784,256], index: 1, kind: input, shape index: {}]   ;;  %s2263_s2 = inlined_call_operand.vmem [shape: f32[1,256], index: 2, kind: input, shape index: {}]   ;;  %s2264_s3 = inlined_call_operand.vmem [shape: bf16[256,128], index: 3, kind: input, shape index: {}]   ;;  %s2265_s4 = inlined_call_operand.vmem [shape: f32[1,128], index: 4, kind: input, shape index: {}]   ;;  %s2266_s5 = inlined_call_operand.hbm [shape: bf16[128,128], index: 5, kind: input, shape index: {}]   ;;  %s2267_s6 = inlined_call_operand.vmem [shape: f32[1,128], index: 6, kind: input, shape index: {}]   ;;  %s2268_s7 = inlined_call_operand.vmem [shape: f32[128,10], index: 7, kind: input, shape index: {}]   ;;  %s2269_s8 = inlined_call_operand.vmem [shape: f32[1,10], index: 8, kind: input, shape index: {}]   ;;  %s2270_s9 = inlined_call_operand.hbm [shape: f32[8,10], index: 9, kind: output, shape index: {}]  }
   0x1   :  { %15 = vsyncpa [#allocation4], 0  ;;  %s1741_s30 = smov [#allocation2]   ;;  %s1693_s13 = scalar_lea.hbm %s2266_s5, 1024 }
   0x2   :  { %s31_s10 = sshll.u32 %s1741_s30, 4  ;;  %p1694_p0 = scmp.ne.s32.totalorder %s2266_s5, %s1693_s13  ;;  %s32_s10 = int_to_ptr.vmem [resolvable:$true] %s31_s10 }
   0x3   :  { %p1697_p1 = scmp.lt.u32.totalorder %s1693_s13, %s2266_s5 }
   0x5   :  { %p1699_p2 = pnand %p1697_p1, %p1694_p0 }
   0x7   :  { %1702 = shalt.err (!%p1699_p2)
}
   0x8   :  { %s1703_s18 = scalar_lea.vmem %s32_s10, 1024  ;;  %p1708_p4 = scmp.lt.s32.totalorder %s32_s10, %s32_s10 }
   0x9   :  { %p1704_p3 = scmp.ne.s32.totalorder %s32_s10, %s1703_s18  ;;  %p1709_p5 = scmp.lt.s32.totalorder %s1703_s18, %s1703_s18 }
   0xb   :  { %p1710_p6 = por %p1709_p5, %p1708_p4 }
   0xd   :  { %p1711_p7 = pnand %p1710_p6, %p1704_p3 }
   0xf   :  { %1714 = shalt.err (!%p1711_p7)
}
  0x10   :  { %s1742_s19 = smov 64   ;;  %s1743_s20 = smov 4  }
  0x11   :  { %37 = dma.hbm_to_vmem [thread:$0]  %s2266_s5, 1024, %s32_s10, [#allocation3], %s1742_s19, %s1742_s19, %s1743_s20  }
  0x12   :  { %1737 = dma.done.wait [#allocation3], 1024  }
  0x13   :  { %1738 = vsyncadd [#allocation3], 4294966272  ;;  %v1518_v0 = vld [vmem:[%s2262_s1 + $0x104] ss:$8 sps:$4 sm:$0xff]   ;;  %v1520_v1 = vld [vmem:[%s2262_s1 + $0x100] ss:$8 sps:$4 sm:$0xff]  }
  0x14   :  { %707 = vmatprep.subr.bf16.mxu0 %v1518_v0  ;;  %v1521_v2 = vld [vmem:[%s2262_s1 + $0x114] ss:$8 sps:$4 sm:$0xff]   ;;  %v1523_v3 = vld [vmem:[%s2262_s1 + $0x110] ss:$8 sps:$4 sm:$0xff]   ;;  %v1524_v4 = vld [vmem:[%s2262_s1 + $0x124] ss:$8 sps:$4 sm:$0xff]  }
  0x15   :  { %708 = vmatpush1.bf16.msra.mxu0 %v1520_v1  ;;  %v1526_v5 = vld [vmem:[%s2262_s1 + $0x120] ss:$8 sps:$4 sm:$0xff]   ;;  %v1527_v6 = vld [vmem:[%s2262_s1 + $0x134] ss:$8 sps:$4 sm:$0xff]   ;;  %v1529_v7 = vld [vmem:[%s2262_s1 + $0x130] ss:$8 sps:$4 sm:$0xff]  }
  0x16   :  { %709 = vmatprep.subr.bf16.mxu0 %v1521_v2  ;;  %v1530_v8 = vld [vmem:[%s2262_s1 + $0x144] ss:$8 sps:$4 sm:$0xff]   ;;  %v1532_v9 = vld [vmem:[%s2262_s1 + $0x140] ss:$8 sps:$4 sm:$0xff]   ;;  %v1533_v10 = vld [vmem:[%s2262_s1 + $0x154] ss:$8 sps:$4 sm:$0xff]  }
  0x17   :  { %v1535_v11 = vld [vmem:[%s2262_s1 + $0x150] ss:$8 sps:$4 sm:$0xff]   ;;  %v1536_v12 = vld [vmem:[%s2262_s1 + $0x164] ss:$8 sps:$4 sm:$0xff]   ;;  %v1538_v15 = vld [vmem:[%s2262_s1 + $0x160] ss:$8 sps:$4 sm:$0xff]  }
  0x18   :  { %v51_v13 = vld [vmem:[%s2261_s0 + $0x18] sm:$0xff]  ;;  %v1572_v17 = vld [vmem:[%s2262_s1 + $0x4] ss:$8 sps:$4 sm:$0xff]   ;;  %v1577_v20 = vld [vmem:[%s2262_s1] ss:$8 sps:$4 sm:$0xff]   ;;  %vm662_vm0 = vcmask 130048  }
  0x19   :  { %710 = vmatpush1.bf16.msra.mxu0 %v1523_v3  ;;  %v58_v14 = vpack.c.bf16 %v51_v13, %v51_v13  ;;  %v1539_v16 = vld [vmem:[%s2262_s1 + $0x174] ss:$8 sps:$4 sm:$0xff]   ;;  %v1541_v18 = vld [vmem:[%s2262_s1 + $0x170] ss:$8 sps:$4 sm:$0xff]   ;;  %v1542_v19 = vld [vmem:[%s2262_s1 + $0x184] ss:$8 sps:$4 sm:$0xff]   ;;  %666 = vmatprep.subr.bf16.mxu1 %v1572_v17 }
  0x1a   :  { %711 = vmatprep.subr.bf16.mxu0 %v1524_v4  ;;  %v1578_v21 = vld [vmem:[%s2262_s1 + $0x14] ss:$8 sps:$4 sm:$0xff]   ;;  %667 = vmatpush1.bf16.msra.mxu1 %v1577_v20  ;;  %v1583_v22 = vld [vmem:[%s2262_s1 + $0x10] ss:$8 sps:$4 sm:$0xff]   ;;  %v1584_v23 = vld [vmem:[%s2262_s1 + $0x24] ss:$8 sps:$4 sm:$0xff]  }
  0x1b   :  { %739 = vmatprep.mubr.bf16.mxu0 %v58_v14  ;;  %668 = vmatprep.subr.bf16.mxu1 %v1578_v21  ;;  %v1544_v24 = vld [vmem:[%s2262_s1 + $0x180] ss:$8 sps:$4 sm:$0xff]   ;;  %v1545_v25 = vld [vmem:[%s2262_s1 + $0x194] ss:$8 sps:$4 sm:$0xff]   ;;  %v1547_v28 = vld [vmem:[%s2262_s1 + $0x190] ss:$8 sps:$4 sm:$0xff]  }
  0x1c   :  { %v1589_v26 = vld [vmem:[%s2262_s1 + $0x20] ss:$8 sps:$4 sm:$0xff]   ;;  %v1590_v27 = vld [vmem:[%s2262_s1 + $0x34] ss:$8 sps:$4 sm:$0xff]   ;;  %v1548_v29 = vld [vmem:[%s2262_s1 + $0x1a4] ss:$8 sps:$4 sm:$0xff]  }
  0x1d   :  { %712 = vmatpush1.bf16.msra.mxu0 %v1526_v5  ;;  %v1595_v30 = vld [vmem:[%s2262_s1 + $0x30] ss:$8 sps:$4 sm:$0xff]   ;;  %v1596_v31 = vld [vmem:[%s2262_s1 + $0x44] ss:$8 sps:$4 sm:$0xff]   ;;  %v1550_v32 = vld [vmem:[%s2262_s1 + $0x1a0] ss:$8 sps:$4 sm:$0xff]  }
  0x1e   :  { %713 = vmatprep.subr.bf16.mxu0 %v1527_v6  ;;  %669 = vmatpush1.bf16.msra.mxu1 %v1583_v22  ;;  %v1551_v33 = vld [vmem:[%s2262_s1 + $0x1b4] ss:$8 sps:$4 sm:$0xff]   ;;  %v1601_v34 = vld [vmem:[%s2262_s1 + $0x40] ss:$8 sps:$4 sm:$0xff]   ;;  %v1553_v36 = vld [vmem:[%s2262_s1 + $0x1b0] ss:$8 sps:$4 sm:$0xff]  }
  0x1f   :  { %670 = vmatprep.subr.bf16.mxu1 %v1584_v23  ;;  %v1602_v35 = vld [vmem:[%s2262_s1 + $0x54] ss:$8 sps:$4 sm:$0xff]   ;;  %v1554_v37 = vld [vmem:[%s2262_s1 + $0x1c4] ss:$8 sps:$4 sm:$0xff]   ;;  %v1607_v38 = vld [vmem:[%s2262_s1 + $0x50] ss:$8 sps:$4 sm:$0xff]  }
  0x20   :  { %v1608_v39 = vld [vmem:[%s2262_s1 + $0x64] ss:$8 sps:$4 sm:$0xff]   ;;  %v1556_v40 = vld [vmem:[%s2262_s1 + $0x1c0] ss:$8 sps:$4 sm:$0xff]   ;;  %v1557_v41 = vld [vmem:[%s2262_s1 + $0x1d4] ss:$8 sps:$4 sm:$0xff]  }
  0x21   :  { %714 = vmatpush1.bf16.msra.mxu0 %v1529_v7  ;;  %v1613_v42 = vld [vmem:[%s2262_s1 + $0x60] ss:$8 sps:$4 sm:$0xff]   ;;  %v1614_v43 = vld [vmem:[%s2262_s1 + $0x74] ss:$8 sps:$4 sm:$0xff]   ;;  %v1559_v44 = vld [vmem:[%s2262_s1 + $0x1d0] ss:$8 sps:$4 sm:$0xff]  }
  0x22   :  { %715 = vmatprep.subr.bf16.mxu0 %v1530_v8  ;;  %671 = vmatpush1.bf16.msra.mxu1 %v1589_v26  ;;  %v1560_v45 = vld [vmem:[%s2262_s1 + $0x1e4] ss:$8 sps:$4 sm:$0xff]   ;;  %v1619_v46 = vld [vmem:[%s2262_s1 + $0x70] ss:$8 sps:$4 sm:$0xff]   ;;  %v1562_v48 = vld [vmem:[%s2262_s1 + $0x1e0] ss:$8 sps:$4 sm:$0xff]  }
  0x23   :  { %672 = vmatprep.subr.bf16.mxu1 %v1590_v27  ;;  %v1620_v47 = vld [vmem:[%s2262_s1 + $0x84] ss:$8 sps:$4 sm:$0xff]   ;;  %v1563_v49 = vld [vmem:[%s2262_s1 + $0x1f4] ss:$8 sps:$4 sm:$0xff]   ;;  %v1625_v50 = vld [vmem:[%s2262_s1 + $0x80] ss:$8 sps:$4 sm:$0xff]  }
  0x24   :  { %v1565_v51 = vld [vmem:[%s2262_s1 + $0x1f0] ss:$8 sps:$4 sm:$0xff]   ;;  %v1626_v52 = vld [vmem:[%s2262_s1 + $0x94] ss:$8 sps:$4 sm:$0xff]   ;;  %v1568_v54 = vld [vmem:[%s2262_s1 + $0x204] ss:$8 sps:$4 sm:$0xff]  }
  0x25   :  { %716 = vmatpush1.bf16.msra.mxu0 %v1532_v9  ;;  %v50_v53 = vld [vmem:[%s2261_s0 + $0x10] sm:$0xff]  ;;  %v1632_v56 = vld [vmem:[%s2262_s1 + $0xa4] ss:$8 sps:$4 sm:$0xff]   ;;  %v1566_v59 = vld [vmem:[%s2262_s1 + $0x200] ss:$8 sps:$4 sm:$0xff]   ;;  %vm1746_vm1 = vmmov 0  }
  0x26   :  { %717 = vmatprep.subr.bf16.mxu0 %v1533_v10  ;;  %673 = vmatpush1.bf16.msra.mxu1 %v1595_v30  ;;  %v1631_v55 = vld [vmem:[%s2262_s1 + $0x90] ss:$8 sps:$4 sm:$0xff]   ;;  %v57_v57 = vpack.c.bf16 %v50_v53, %v50_v53  ;;  %v53_v58 = vld [vmem:[%s2261_s0 + $0x28] sm:$0xff]  ;;  %v1571_v61 = vld [vmem:[%s2262_s1 + $0x214] ss:$8 sps:$4 sm:$0xff]   ;;  %vm1216_vm2 = vcmask 80896  }
  0x27   :  { %674 = vmatprep.subr.bf16.mxu1 %v1596_v31  ;;  %v60_v60 = vpack.c.bf16 %v53_v58, %v53_v58  ;;  %v1637_v62 = vld [vmem:[%s2262_s1 + $0xa0] ss:$8 sps:$4 sm:$0xff]   ;;  %v1638_v63 = vld [vmem:[%s2262_s1 + $0xb4] ss:$8 sps:$4 sm:$0xff]   ;;  %v1569_v1 = vld [vmem:[%s2262_s1 + $0x210] ss:$8 sps:$4 sm:$0xff]  }
  0x28   :  { %v49_v0 = vld [vmem:[%s2261_s0 + $0x8] sm:$0xff]  ;;  %v1643_v4 = vld [vmem:[%s2262_s1 + $0xb0] ss:$8 sps:$4 sm:$0xff]   ;;  %v1582_v7 = vld [vmem:[%s2262_s1 + $0x234] ss:$8 sps:$4 sm:$0xff]  }
  0x29   :  { %718 = vmatpush1.bf16.msra.mxu0 %v1535_v11  ;;  %v56_v2 = vpack.c.bf16 %v49_v0, %v49_v0  ;;  %v1576_v3 = vld [vmem:[%s2262_s1 + $0x224] ss:$8 sps:$4 sm:$0xff]   ;;  %v1574_v6 = vld [vmem:[%s2262_s1 + $0x220] ss:$8 sps:$4 sm:$0xff]   ;;  %v1650_v9 = vld [vmem:[%s2262_s1 + $0xd4] ss:$8 sps:$4 sm:$0xff]  }
  0x2a   :  { %719 = vmatprep.subr.bf16.mxu0 %v1536_v12  ;;  %675 = vmatpush1.bf16.msra.mxu1 %v1601_v34  ;;  %v1644_v5 = vld [vmem:[%s2262_s1 + $0xc4] ss:$8 sps:$4 sm:$0xff]   ;;  %v1649_v8 = vld [vmem:[%s2262_s1 + $0xc0] ss:$8 sps:$4 sm:$0xff]   ;;  %v1580_v10 = vld [vmem:[%s2262_s1 + $0x230] ss:$8 sps:$4 sm:$0xff]  }
  0x2b   :  { %676 = vmatprep.subr.bf16.mxu1 %v1602_v35  ;;  %698 = vmatprep.mubr.bf16.mxu1 %v56_v2  ;;  %v1588_v11 = vld [vmem:[%s2262_s1 + $0x244] ss:$8 sps:$4 sm:$0xff]   ;;  %v1586_v12 = vld [vmem:[%s2262_s1 + $0x240] ss:$8 sps:$4 sm:$0xff]   ;;  %v1655_v13 = vld [vmem:[%s2262_s1 + $0xd0] ss:$8 sps:$4 sm:$0xff]  }
  0x2c   :  { %v1656_v14 = vld [vmem:[%s2262_s1 + $0xe4] ss:$8 sps:$4 sm:$0xff]   ;;  %v1662_v17 = vld [vmem:[%s2262_s1 + $0xf4] ss:$8 sps:$4 sm:$0xff]   ;;  %v1664_v20 = vld [vmem:[%s2262_s1 + $0xf0] ss:$8 sps:$4 sm:$0xff]  }
  0x2d   :  { %720 = vmatpush1.bf16.msra.mxu0 %v1538_v15  ;;  %v1594_v15 = vld [vmem:[%s2262_s1 + $0x254] ss:$8 sps:$4 sm:$0xff]   ;;  %v48_v21 = vld [vmem:[%s2261_s0] sm:$0xff]  ;;  %v1667_v27 = vld [vmem:[%s2264_s3 + $0x48] sm:$0xff]  }
  0x2e   :  { %721 = vmatprep.subr.bf16.mxu0 %v1539_v16  ;;  %677 = vmatpush1.bf16.msra.mxu1 %v1607_v38  ;;  %v1661_v16 = vld [vmem:[%s2262_s1 + $0xe0] ss:$8 sps:$4 sm:$0xff]   ;;  %v1669_v31 = vld [vmem:[%s2264_s3 + $0x50] sm:$0xff]   ;;  %v1671_v35 = vld [vmem:[%s2264_s3 + $0x58] sm:$0xff]  }
  0x2f   :  { %678 = vmatprep.subr.bf16.mxu1 %v1608_v39  ;;  %v1665_v22 = vld [vmem:[%s2264_s3 + $0x40] sm:$0xff]   ;;  %v1668_v30 = vld [vmem:[%s2264_s3 + $0x8] sm:$0xff]   ;;  %v1670_v34 = vld [vmem:[%s2264_s3 + $0x10] sm:$0xff]  }
  0x30   :  { %v1598_v23 = vld [vmem:[%s2262_s1 + $0x260] ss:$8 sps:$4 sm:$0xff]   ;;  %v1672_v38 = vld [vmem:[%s2264_s3 + $0x18] sm:$0xff]   ;;  %v1660_v53 = vld [vmem:[%s2262_s1 + $0x304] ss:$8 sps:$4 sm:$0xff]  }
  0x31   :  { %722 = vmatpush1.bf16.msra.mxu0 %v1541_v18  ;;  %v1592_v18 = vld [vmem:[%s2262_s1 + $0x250] ss:$8 sps:$4 sm:$0xff]   ;;  %v1666_v26 = vld [vmem:[%s2264_s3] sm:$0xff]  }
  0x32   :  { %723 = vmatprep.subr.bf16.mxu0 %v1542_v19  ;;  %679 = vmatpush1.bf16.msra.mxu1 %v1613_v42  ;;  %v1600_v19 = vld [vmem:[%s2262_s1 + $0x264] ss:$8 sps:$4 sm:$0xff]   ;;  %v1680_v0 = vld [vmem:[%s2264_s3 + $0x38] sm:$0xff]  }
  0x33   :  { %680 = vmatprep.subr.bf16.mxu1 %v1614_v43  ;;  %v1673_v39 = vld [vmem:[%s2264_s3 + $0x60] sm:$0xff]   ;;  %v1628_v43 = vld [vmem:[%s2262_s1 + $0x2b0] ss:$8 sps:$4 sm:$0xff]  }
  0x34   :  { %v1674_v42 = vld [vmem:[%s2264_s3 + $0x20] sm:$0xff]  }
  0x35   :  { %724 = vmatpush1.bf16.msra.mxu0 %v1544_v24  ;;  %v1606_v24 = vld [vmem:[%s2262_s1 + $0x274] ss:$8 sps:$4 sm:$0xff]  }
  0x36   :  { %725 = vmatprep.subr.bf16.mxu0 %v1545_v25  ;;  %681 = vmatpush1.bf16.msra.mxu1 %v1619_v46  ;;  %v55_v25 = vpack.c.bf16 %v48_v21, %v48_v21  ;;  %v1642_v46 = vld [vmem:[%s2262_s1 + $0x2d4] ss:$8 sps:$4 sm:$0xff]  }
  0x37   :  { %682 = vmatprep.subr.bf16.mxu1 %v1620_v47  ;;  %v1640_v47 = vld [vmem:[%s2262_s1 + $0x2d0] ss:$8 sps:$4 sm:$0xff]  }
  0x39   :  { %726 = vmatpush1.bf16.msra.mxu0 %v1547_v28  ;;  %v1604_v28 = vld [vmem:[%s2262_s1 + $0x270] ss:$8 sps:$4 sm:$0xff]  }
  0x3a   :  { %727 = vmatprep.subr.bf16.mxu0 %v1548_v29  ;;  %683 = vmatpush1.bf16.msra.mxu1 %v1625_v50  ;;  %v1612_v29 = vld [vmem:[%s2262_s1 + $0x284] ss:$8 sps:$4 sm:$0xff]   ;;  %v1654_v50 = vld [vmem:[%s2262_s1 + $0x2f4] ss:$8 sps:$4 sm:$0xff]  }
  0x3b   :  { %684 = vmatprep.subr.bf16.mxu1 %v1626_v52  ;;  %v52_v52 = vld [vmem:[%s2261_s0 + $0x20] sm:$0xff] }
  0x3d   :  { %728 = vmatpush1.bf16.msra.mxu0 %v1550_v32  ;;  %v1610_v32 = vld [vmem:[%s2262_s1 + $0x280] ss:$8 sps:$4 sm:$0xff]  }
  0x3e   :  { %729 = vmatprep.subr.bf16.mxu0 %v1551_v33  ;;  %685 = vmatpush1.bf16.msra.mxu1 %v1631_v55  ;;  %v1618_v33 = vld [vmem:[%s2262_s1 + $0x294] ss:$8 sps:$4 sm:$0xff]   ;;  %v1658_v55 = vld [vmem:[%s2262_s1 + $0x300] ss:$8 sps:$4 sm:$0xff]  }
  0x3f   :  { %686 = vmatprep.subr.bf16.mxu1 %v1632_v56  ;;  %v1744_v56 = vmov 0  }
  0x41   :  { %730 = vmatpush1.bf16.msra.mxu0 %v1553_v36  ;;  %v1616_v36 = vld [vmem:[%s2262_s1 + $0x290] ss:$8 sps:$4 sm:$0xff]  }
  0x42   :  { %731 = vmatprep.subr.bf16.mxu0 %v1554_v37  ;;  %687 = vmatpush1.bf16.msra.mxu1 %v1637_v62  ;;  %v1624_v37 = vld [vmem:[%s2262_s1 + $0x2a4] ss:$8 sps:$4 sm:$0xff]   ;;  %v1678_v62 = vld [vmem:[%s2264_s3 + $0x30] sm:$0xff]  }
  0x43   :  { %688 = vmatprep.subr.bf16.mxu1 %v1638_v63  ;;  %v1679_v63 = vld [vmem:[%s2264_s3 + $0x78] sm:$0xff]  }
  0x45   :  { %732 = vmatpush1.bf16.msra.mxu0 %v1556_v40  ;;  %v1622_v40 = vld [vmem:[%s2262_s1 + $0x2a0] ss:$8 sps:$4 sm:$0xff]  }
  0x46   :  { %733 = vmatprep.subr.bf16.mxu0 %v1557_v41  ;;  %689 = vmatpush1.bf16.msra.mxu1 %v1643_v4  ;;  %v1630_v41 = vld [vmem:[%s2262_s1 + $0x2b4] ss:$8 sps:$4 sm:$0xff]  }
  0x47   :  { %690 = vmatprep.subr.bf16.mxu1 %v1644_v5 }
  0x49   :  { %734 = vmatpush1.bf16.msra.mxu0 %v1559_v44  ;;  %v1636_v44 = vld [vmem:[%s2262_s1 + $0x2c4] ss:$8 sps:$4 sm:$0xff]  }
  0x4a   :  { %735 = vmatprep.subr.bf16.mxu0 %v1560_v45  ;;  %691 = vmatpush1.bf16.msra.mxu1 %v1649_v8  ;;  %v1634_v45 = vld [vmem:[%s2262_s1 + $0x2c0] ss:$8 sps:$4 sm:$0xff]  }
  0x4b   :  { %692 = vmatprep.subr.bf16.mxu1 %v1650_v9  ;;  %v160_v9 = vld [vmem:[%s2263_s2] sm:$0x3] }
  0x4d   :  { %736 = vmatpush1.bf16.msra.mxu0 %v1562_v48  ;;  %v1648_v48 = vld [vmem:[%s2262_s1 + $0x2e4] ss:$8 sps:$4 sm:$0xff]  }
  0x4e   :  { %737 = vmatprep.subr.bf16.mxu0 %v1563_v49  ;;  %693 = vmatpush1.bf16.msra.mxu1 %v1655_v13  ;;  %v1646_v49 = vld [vmem:[%s2262_s1 + $0x2e0] ss:$8 sps:$4 sm:$0xff]  }
  0x4f   :  { %694 = vmatprep.subr.bf16.mxu1 %v1656_v14 }
  0x51   :  { %738 = vmatpush1.bf16.msra.mxu0 %v1565_v51  ;;  %v1652_v51 = vld [vmem:[%s2262_s1 + $0x2f0] ss:$8 sps:$4 sm:$0xff]  }
  0x52   :  { %748 = vmatprep.subr.bf16.mxu0 %v1568_v54  ;;  %695 = vmatpush1.bf16.msra.mxu1 %v1661_v16  ;;  %v59_v54 = vpack.c.bf16 %v52_v52, %v52_v52  ;;  %v1129_v52 = vld [vmem:[%s2268_s7 + $0x30] sm:$0xff] }
  0x53   :  { %696 = vmatprep.subr.bf16.mxu1 %v1662_v17 }
  0x54   :  { %740 = vmatmul.mubr.bf16.vlgmr.msra.gmra.mrb[0].mxu0 %v57_v57  ;;  %v54_v57 = vld [vmem:[%s2261_s0 + $0x30] sm:$0xff] }
  0x55   :  { %749 = vmatpush1.bf16.msra.mxu0 %v1566_v59  ;;  %780 = vmatprep.mubr.bf16.mxu0 %v60_v60  ;;  %v61_v58 = vpack.c.bf16 %v54_v57, %v54_v57  ;;  %v1675_v59 = vld [vmem:[%s2264_s3 + $0x68] sm:$0xff]  }
  0x56   :  { %750 = vmatprep.subr.bf16.mxu0 %v1571_v61  ;;  %697 = vmatpush1.bf16.msra.mxu1 %v1664_v20  ;;  %v1676_v60 = vld [vmem:[%s2264_s3 + $0x28] sm:$0xff]   ;;  %v1677_v61 = vld [vmem:[%s2264_s3 + $0x70] sm:$0xff]  }
  0x57   :  { %1371 = vmatprep.subr.bf16.mxu1 %v1665_v22 }
  0x59   :  { %751 = vmatpush1.bf16.msra.mxu0 %v1569_v1  ;;  %699 = vmatmul.mubr.bf16.vlgmr.msra.gmra.mrb[0].mxu1 %v55_v25  ;;  %v1745_v1 = vmov 0.0  }
  0x5a   :  { %752 = vmatprep.subr.bf16.mxu0 %v1576_v3  ;;  %1372 = vmatpush3.bf16.msra.mxu1 %v1666_v26  ;;  %v1682_v26 = vld [vmem:[#allocation2 + $0x8] sm:$0xff]  }
  0x5b   :  { %1373 = vmatprep.subr.bf16.mxu1 %v1667_v27  ;;  %v1683_v27 = vld [vmem:[#allocation2 + $0x10] sm:$0xff]  }
  0x5d   :  { %753 = vmatpush1.bf16.msra.mxu0 %v1574_v6  ;;  %v162_v6 = vlaneseq }
  0x5e   :  { %754 = vmatprep.subr.bf16.mxu0 %v1582_v7  ;;  %1374 = vmatpush3.bf16.msra.mxu1 %v1668_v30  ;;  %v1686_v30 = vld [vmem:[#allocation2 + $0x28] sm:$0xff]  }
  0x5f   :  { %1375 = vmatprep.subr.bf16.mxu1 %v1669_v31  ;;  %v163_v7 = vshrl.u32 %v162_v6, 7  ;;  %v1687_v31 = vld [vmem:[#allocation2 + $0x30] sm:$0xff]  }
  0x61   :  { %755 = vmatpush1.bf16.msra.mxu0 %v1580_v10  ;;  %v164_v8 = vsub.s32 0, %v163_v7  ;;  %v168_v10 = vsub.s32 1, %v163_v7 }
  0x62   :  { %756 = vmatprep.subr.bf16.mxu0 %v1588_v11  ;;  %1376 = vmatpush3.bf16.msra.mxu1 %v1670_v34 }
  0x63   :  { %1377 = vmatprep.subr.bf16.mxu1 %v1671_v35  ;;  %v165_v11 = vrot.slane %v160_v9, %v164_v8  ;;  %v1344_v35 = vld [vmem:[%s2265_s4] ss:$0 sm:$0xff] }
  0x65   :  { %757 = vmatpush1.bf16.msra.mxu0 %v1586_v12  ;;  %v169_v12 = vrot.slane %v160_v9, %v168_v10  ;;  %v1370_v10 = vld [vmem:[%s2269_s8] ss:$0 sm:$0xff] }
  0x66   :  { %758 = vmatprep.subr.bf16.mxu0 %v1594_v15  ;;  %1378 = vmatpush3.bf16.msra.mxu1 %v1672_v38 }
  0x67   :  { %1379 = vmatprep.subr.bf16.mxu1 %v1673_v39 }
  0x69   :  { %759 = vmatpush1.bf16.msra.mxu0 %v1592_v18 }
  0x6a   :  { %760 = vmatprep.subr.bf16.mxu0 %v1600_v19  ;;  %1380 = vmatpush3.bf16.msra.mxu1 %v1674_v42  ;;  %v1124_v42 = vld [vmem:[%s2268_s7 + $0x8] sm:$0xff] }
  0x6b   :  { %1381 = vmatprep.subr.bf16.mxu1 %v1675_v59  ;;  %v1134_v59 = vld [vmem:[%s2268_s7 + $0x58] sm:$0xff] }
  0x6d   :  { %761 = vmatpush1.bf16.msra.mxu0 %v1598_v23 }
  0x6e   :  { %762 = vmatprep.subr.bf16.mxu0 %v1606_v24  ;;  %1382 = vmatpush3.bf16.msra.mxu1 %v1676_v60  ;;  %v1681_v24 = vld [vmem:[#allocation2] sm:$0xff]  }
  0x6f   :  { %1383 = vmatprep.subr.bf16.mxu1 %v1677_v61  ;;  %v1135_v61 = vld [vmem:[%s2268_s7 + $0x60] sm:$0xff] }
  0x71   :  { %763 = vmatpush1.bf16.msra.mxu0 %v1604_v28  ;;  %v1684_v28 = vld [vmem:[#allocation2 + $0x18] sm:$0xff]  }
  0x72   :  { %764 = vmatprep.subr.bf16.mxu0 %v1612_v29  ;;  %1384 = vmatpush3.bf16.msra.mxu1 %v1678_v62  ;;  %v1685_v29 = vld [vmem:[#allocation2 + $0x20] sm:$0xff]   ;;  %v1136_v62 = vld [vmem:[%s2268_s7 + $0x68] sm:$0xff] }
  0x73   :  { %1385 = vmatprep.subr.bf16.mxu1 %v1679_v63  ;;  %v1493_v63 = vpack.c.bf16 %v1136_v62, %v1135_v61 }
  0x75   :  { %765 = vmatpush1.bf16.msra.mxu0 %v1610_v32  ;;  %v1688_v32 = vld [vmem:[#allocation2 + $0x38] sm:$0xff]  }
  0x76   :  { %766 = vmatprep.subr.bf16.mxu0 %v1618_v33  ;;  %1386 = vmatpush3.bf16.msra.mxu1 %v1680_v0  ;;  %v1747_v33 = vmov 0.0|0.0   ;;  %v1137_v0 = vld [vmem:[%s2268_s7 + $0x70] sm:$0xff] }
  0x77   :  { %1419 = vmatprep.subr.bf16.mxu1 %v1745_v1 }
  0x79   :  { %767 = vmatpush1.bf16.msra.mxu0 %v1616_v36 }
  0x7a   :  { %768 = vmatprep.subr.bf16.mxu0 %v1624_v37 }
  0x7d   :  { %769 = vmatpush1.bf16.msra.mxu0 %v1622_v40 }
  0x7e   :  { %770 = vmatprep.subr.bf16.mxu0 %v1630_v41  ;;  %v1123_v41 = vld [vmem:[%s2268_s7] sm:$0xff] }
  0x81   :  { %771 = vmatpush1.bf16.msra.mxu0 %v1628_v43 }
  0x82   :  { %772 = vmatprep.subr.bf16.mxu0 %v1636_v44  ;;  %v1475_v44 = vpack.c.bf16 %v1124_v42, %v1123_v41 }
  0x85   :  { %773 = vmatpush1.bf16.msra.mxu0 %v1634_v45 }
  0x86   :  { %774 = vmatprep.subr.bf16.mxu0 %v1642_v46  ;;  %v1125_v46 = vld [vmem:[%s2268_s7 + $0x10] sm:$0xff] }
  0x89   :  { %775 = vmatpush1.bf16.msra.mxu0 %v1640_v47  ;;  %v1126_v47 = vld [vmem:[%s2268_s7 + $0x18] sm:$0xff] }
  0x8a   :  { %776 = vmatprep.subr.bf16.mxu0 %v1648_v48  ;;  %v1478_v48 = vpack.c.bf16 %v1126_v47, %v1125_v46 }
  0x8d   :  { %777 = vmatpush1.bf16.msra.mxu0 %v1646_v49  ;;  %v1127_v49 = vld [vmem:[%s2268_s7 + $0x20] sm:$0xff] }
  0x8e   :  { %778 = vmatprep.subr.bf16.mxu0 %v1654_v50  ;;  %v1128_v50 = vld [vmem:[%s2268_s7 + $0x28] sm:$0xff] }
  0x91   :  { %779 = vmatpush1.bf16.msra.mxu0 %v1652_v51  ;;  %v1481_v51 = vpack.c.bf16 %v1128_v50, %v1127_v49 }
  0x92   :  { %789 = vmatprep.subr.bf16.mxu0 %v1660_v53  ;;  %v1130_v53 = vld [vmem:[%s2268_s7 + $0x38] sm:$0xff] }
  0x94   :  { %781 = vmatmul.mubr.bf16.vlgmr.msra.gmra.mrb[0].mxu0 %v59_v54  ;;  %v1484_v54 = vpack.c.bf16 %v1130_v53, %v1129_v52 }
  0x95   :  { %790 = vmatpush1.bf16.msra.mxu0 %v1658_v55  ;;  %821 = vmatprep.mubr.bf16.mxu0 %v1744_v56  ;;  %v1131_v55 = vld [vmem:[%s2268_s7 + $0x40] sm:$0xff]  ;;  %v1132_v56 = vld [vmem:[%s2268_s7 + $0x48] sm:$0xff] }
  0x96   :  { %v1487_v57 = vpack.c.bf16 %v1132_v56, %v1131_v55 }
  0xa0   :  { %1343 = vmatmul.mubr.msk.bf16.vlgmr.msra.gmra.mrb[0].mxu0 %vm662_vm0, %v61_v58  ;;  %v1133_v58 = vld [vmem:[%s2268_s7 + $0x50] sm:$0xff] }
  0xa1   :  { %v1490_v60 = vpack.c.bf16 %v1134_v59, %v1133_v58 }
 0x12c   :  { %v700_v2 = vpop.f32.mrb[0].mxu1 }
 0x12d   :  { %v702_v3 = vpop.f32.mrb[1].mxu1  ;;  %v701_v13 = vadd.f32 %v700_v2, %v165_v11 }
 0x12e   :  { %v704_v4 = vpop.f32.mrb[2].mxu1  ;;  %v703_v14 = vadd.f32 %v702_v3, %v169_v12  ;;  %v1361_v3 = vld [vmem:[%s2267_s6] ss:$0 sm:$0xff]  ;;  %s1748_s6 = smov [#allocation5]  }
 0x12f   :  { %v705_v5 = vpop.f32.mrb[3].mxu1 }
 0x173   :  { %v823_v15 = vpop.f32.mrb[0].mxu0 }
 0x174   :  { %v1499_v16 = vadd.f32 %v823_v15, %v701_v13  ;;  %v825_v17 = vpop.f32.mrb[1].mxu0 }
 0x175   :  { %v1501_v18 = vadd.f32 %v825_v17, %v703_v14  ;;  %v827_v19 = vpop.f32.mrb[2].mxu0 }
 0x176   :  { %v830_v20 = vmax.f32 %v1499_v16, 0.0  ;;  %v828_v21 = vpop.f32.mrb[3].mxu0 }
 0x177   :  { %v831_v22 = vmax.f32 %v1501_v18, 0.0 }
 0x178   :  { %v832_v25 = vpack.c.bf16 %v830_v20, %v830_v20 }
 0x179   :  { %v833_v23 = vpack.c.bf16 %v831_v22, %v831_v22 }
 0x17b   :  { %1001 = vmatprep.mubr.bf16.mxu1 %v833_v23 }
 0x17c   :  { %1002 = vmatmul.mubr.bf16.vlgmr.msra.gmra.mrb[4].mxu1 %v832_v25 }
 0x17d   :  { %1420 = vmatpush3.bf16.msra.mxu1 %v1681_v24  ;;  %1435 = vmatprep.mubr.msk.bf16.mxu1 %vm1746_vm1, %v1745_v1 }
 0x17e   :  { %1421 = vmatprep.subr.bf16.mxu1 %v1745_v1 }
 0x181   :  { %1422 = vmatpush3.bf16.msra.mxu1 %v1682_v26 }
 0x182   :  { %1423 = vmatprep.subr.bf16.mxu1 %v1745_v1 }
 0x185   :  { %1424 = vmatpush3.bf16.msra.mxu1 %v1683_v27 }
 0x186   :  { %1425 = vmatprep.subr.bf16.mxu1 %v1745_v1 }
 0x189   :  { %1426 = vmatpush3.bf16.msra.mxu1 %v1684_v28 }
 0x18a   :  { %1427 = vmatprep.subr.bf16.mxu1 %v1745_v1 }
 0x18d   :  { %1428 = vmatpush3.bf16.msra.mxu1 %v1685_v29 }
 0x18e   :  { %1429 = vmatprep.subr.bf16.mxu1 %v1745_v1 }
 0x191   :  { %1430 = vmatpush3.bf16.msra.mxu1 %v1686_v30 }
 0x192   :  { %1431 = vmatprep.subr.bf16.mxu1 %v1745_v1 }
 0x195   :  { %1432 = vmatpush3.bf16.msra.mxu1 %v1687_v31 }
 0x196   :  { %1433 = vmatprep.subr.bf16.mxu1 %v1745_v1 }
 0x199   :  { %1434 = vmatpush3.bf16.msra.mxu1 %v1688_v32 }
 0x19a   :  { %1474 = vmatprep.subr.bf16.mxu1 %v1747_v33 }
 0x24f   :  { %v1387_v34 = vpop.f32.mrb[4].mxu1 }
 0x250   :  { %v1388_v36 = vpop.f32.mrb[5].mxu1 }
 0x251   :  { %v1389_v37 = vadd.f32 %v1388_v36, %v1387_v34  ;;  %v1390_v38 = vpop.f32.mrb[6].mxu1 }
 0x252   :  { %v1391_v39 = vpop.f32.mrb[7].mxu1 }
 0x253   :  { %v1004_v40 = vadd.f32 %v1389_v37, %v1344_v35 }
 0x255   :  { %v1009_v43 = vmax.f32 %v1004_v40, 0.0 }
 0x257   :  { %v1010_v45 = vpack.c.bf16 %v1009_v43, %v1009_v43 }
 0x259   :  { %1436 = vmatmul.mubr.bf16.vlgmr.msra.gmra.mrb[8].mxu1 %v1010_v45 }
 0x25a   :  { %1476 = vmatpush3.bf16.msra.mxu1 %v1475_v44  ;;  %1471 = vmatprep.mubr.msk.f32.mxu1 %vm1746_vm1, %v1745_v1  ;;  %v1138_v1 = vld [vmem:[%s2268_s7 + $0x78] sm:$0xff]  ;;  %s1236_s7 = sshll.u32 %s1748_s6, 4  ;;  %s1237_s7 = int_to_ptr.vmem [resolvable:$true] %s1236_s7 }
 0x25b   :  { %1477 = vmatprep.subr.bf16.mxu1 %v1747_v33  ;;  %v1496_v2 = vpack.c.bf16 %v1138_v1, %v1137_v0  ;;  %s1715_s8 = scalar_lea.vmem %s1237_s7, 128  ;;  %p1720_p9 = scmp.lt.s32.totalorder %s1237_s7, %s1237_s7 }
 0x25c   :  { %p1716_p8 = scmp.ne.s32.totalorder %s1237_s7, %s1715_s8  ;;  %p1721_p10 = scmp.lt.s32.totalorder %s1715_s8, %s1715_s8 }
 0x25e   :  { %1479 = vmatpush3.bf16.msra.mxu1 %v1478_v48  ;;  %p1722_p11 = por %p1721_p10, %p1720_p9 }
 0x25f   :  { %1480 = vmatprep.subr.bf16.mxu1 %v1747_v33 }
 0x260   :  { %p1723_p12 = pnand %p1722_p11, %p1716_p8 }
 0x262   :  { %1482 = vmatpush3.bf16.msra.mxu1 %v1481_v51 }
 0x263   :  { %1483 = vmatprep.subr.bf16.mxu1 %v1747_v33 }
 0x266   :  { %1485 = vmatpush3.bf16.msra.mxu1 %v1484_v54 }
 0x267   :  { %1486 = vmatprep.subr.bf16.mxu1 %v1747_v33 }
 0x26a   :  { %1488 = vmatpush3.bf16.msra.mxu1 %v1487_v57 }
 0x26b   :  { %1489 = vmatprep.subr.bf16.mxu1 %v1747_v33 }
 0x26e   :  { %1491 = vmatpush3.bf16.msra.mxu1 %v1490_v60 }
 0x26f   :  { %1492 = vmatprep.subr.bf16.mxu1 %v1747_v33 }
 0x272   :  { %1494 = vmatpush3.bf16.msra.mxu1 %v1493_v63 }
 0x273   :  { %1495 = vmatprep.subr.bf16.mxu1 %v1747_v33 }
 0x276   :  { %1497 = vmatpush3.bf16.msra.mxu1 %v1496_v2 }
 0x32c   :  { %v1116_v4 = vpop.f32.mrb[8].mxu1 }
 0x32d   :  { %v1117_v5 = vadd.f32 %v1361_v3, %v1116_v4  ;;  %v1437_v6 = vpop.f32.mrb[9].mxu1 }
 0x32e   :  { %v1119_v7 = vpop.f32.mrb[10].mxu1 }
 0x32f   :  { %v1122_v8 = vmax.f32 %v1117_v5, 0.0  ;;  %v1438_v9 = vpop.f32.mrb[11].mxu1 }
 0x331   :  { %1472 = vmatmul.mubr.f32.vlgmr.msra.gmra.mrb[12].mxu1 %v1122_v8 }
 0x404   :  { %v1212_v11 = vpop.f32.mrb[12].mxu1 }
 0x405   :  { %v1213_v12 = vadd.f32 %v1370_v10, %v1212_v11  ;;  %v1473_v13 = vpop.f32.mrb[13].mxu1 }
 0x407   :  { %v1217_v14 = vsel %vm1216_vm2, %v1213_v12, -inf }
 0x408   :  { %1218 = vmax.xlane.f32.xlu0 %v1217_v14 }
 0x495   :  { %v1219_v15 = vpop.xlane.xlu0 %1218 }
 0x496   :  { %v1220_v16 = vsub.f32 %v1213_v12, %v1219_v15 }
 0x498   :  { %v1221_v17 = vmul.f32 1.442695, %v1220_v16 }
 0x49a   :  { %1689 = vpow2.f32 %v1221_v17 }
 0x4a4   :  { %v1690_v18 = vpop.eup %1689 }
 0x4a5   :  { %v1223_v19 = vsel %vm1216_vm2, %v1690_v18, 0.0 }
 0x4a6   :  { %1224 = vadd.xlane.f32.xlu0 %v1223_v19 }
 0x533   :  { %v1225_v20 = vpop.xlane.xlu0 %1224 }
 0x534   :  { %1691 = vlog2.f32 %v1225_v20 }
 0x53e   :  { %v1692_v21 = vpop.eup %1691 }
 0x53f   :  { %v1227_v22 = vmul.f32 0.6931472, %v1692_v21 }
 0x541   :  { %v1228_v23 = vsub.f32 %v1220_v16, %v1227_v22 }
 0x543   :  { %1229 = vst.msk [vmem:[#allocation5] sm:$0xff] %vm1216_vm2, %v1228_v23 }
 0x544   :  { %1726 = shalt.err (!%p1723_p12)
}
 0x545   :  { %s1727_s11 = scalar_lea.hbm %s2270_s9, 128 }
 0x546   :  { %p1728_p13 = scmp.ne.s32.totalorder %s2270_s9, %s1727_s11  ;;  %p1731_p0 = scmp.lt.u32.totalorder %s1727_s11, %s2270_s9 }
 0x548   :  { %p1733_p1 = pnand %p1731_p0, %p1728_p13 }
 0x54a   :  { %1736 = shalt.err (!%p1733_p1)
}
 0x54b   :  { %1239 = dma.vmem_to_hbm [thread:$0]  %s1237_s7, 128, %s2270_s9, [#allocation4]  }
 0x54c   :  { %1739 = dma.done.wait [#allocation4], 128  }
 0x54d   :  { %1740 = vsyncadd [#allocation4], 4294967168 }
 0x54e   :  { %1243 = vsyncpa [#allocation3], 1 }
 0x54f   :  { %1244 = vsyncpa [#allocation4], 1 }

</bundles_post_ra>
